<compile_context>
chip_gen: v7x
topology: tpu7x:2x2x1
jax: 0.10.0
libtpu: 0.0.40
codegen_flags: <defaults>
</compile_context>

<pallas_src>
import functools

import jax
import jax.numpy as jnp
import numpy as np
from jax.experimental import pallas as pl
from jax.experimental.pallas import tpu as pltpu

POOL_K = 31
POOL_PAD = 15
GAMMA = 2
MAX_IMGS_PER_STEP = 8      # static unroll bound for the per-image loop
OUT_LANES = 128            # lane-dense packed-stats output width


# ---------------------------------------------------------------------------
# SSIM window (SSIM.__init__ / create_window) — unused in forward(); created
# only to mirror the module's deterministic parameter initialization.
# ---------------------------------------------------------------------------
def _gaussian(window_size, sigma):
    x = jnp.arange(window_size, dtype=jnp.float32)
    g = jnp.exp(-((x - window_size // 2) ** 2) / (2.0 * sigma ** 2))
    return g / jnp.sum(g)


def create_window(window_size=11, channel=1):
    _1d = _gaussian(window_size, 1.5)[:, None]
    _2d = _1d @ _1d.T
    return jnp.broadcast_to(_2d[None, None], (channel, 1, window_size, window_size))


_SSIM_WINDOW = create_window(11, 1)  # deterministic, unused by forward()


# ---------------------------------------------------------------------------
# Pallas kernel: one grid step handles TB images as a (TB, H, W) block.
# Per image:  pooled = (Rh @ z) @ Rw / 961   (bf16 MXU, f32 accumulation)
#             weit   = 1 + 5 * |pooled - z|
#             bce    = stable BCE-with-logits (one EUP exp shared w/ sigmoid)
#             p      = sigmoid(pred)
# Four per-image sums [sum(bce), sum(weit), sum(p*z*weit), sum((p+z)*weit)]
# are packed into lanes 0..3 of a lane-dense (TB, 128) output tile.
# ---------------------------------------------------------------------------
def _criterion_kernel(pred_ref, targ_ref, rh_ref, rw_ref, out_ref):
    rh = rh_ref[...]                      # (H, H) bf16 0/1 band filter
    rw = rw_ref[...]                      # (W, W) bf16 0/1 band filter
    tb = pred_ref.shape[0]
    inv_area = 1.0 / float(POOL_K * POOL_K)

    rows = []
    for b in range(tb):                   # static unroll, tb <= MAX_IMGS_PER_STEP
        x = pred_ref[b]                   # (H, W) f32 logits
        z16 = targ_ref[b]                 # (H, W) bf16 binary mask (exact)
        z = z16.astype(jnp.float32)

        # 31x31 zero-padded box sum == avg_pool2d(..., count_include_pad=True)
        # as two banded bf16 MXU matmuls with f32 accumulation; row sums are
        # integers <= 31 so the bf16 re-cast before the second matmul is exact.
        row_sum = jnp.dot(rh, z16, preferred_element_type=jnp.float32)       # (H, W)
        box_sum = jnp.dot(row_sum.astype(jnp.bfloat16), rw,
                          preferred_element_type=jnp.float32)                # (H, W)
        pooled = box_sum * inv_area

        weit = 1.0 + 5.0 * jnp.abs(pooled - z)

        # Single EUP exp shared between BCE and sigmoid:
        #   e   = exp(-|x|)
        #   bce = max(x, 0) - x*z + log(1 + e)        (numerically stable)
        #   p   = sigmoid(x) = where(x >= 0, 1, e) / (1 + e)
        e = jnp.exp(-jnp.abs(x))
        bce = jnp.maximum(x, 0.0) - x * z + jnp.log(1.0 + e)
        inv1pe = 1.0 / (1.0 + e)          # exact divide kept for bit-parity
        p = jnp.where(x >= 0.0, 1.0, e) * inv1pe

        def _lsum(a):                     # (H, W) -> (H, 1) lane reduction
            return jnp.sum(a, axis=1, keepdims=True)

        parts = jnp.concatenate(
            [_lsum(bce), _lsum(weit), _lsum(p * z * weit), _lsum((p + z) * weit)],
            axis=1)                                        # (H, 4)
        rows.append(jnp.sum(parts, axis=0, keepdims=True))  # (1, 4)

    stats = jnp.concatenate(rows, axis=0)                  # (TB, 4)
    pad = jnp.zeros((tb, OUT_LANES - 4), dtype=jnp.float32)
    out_ref[0] = jnp.concatenate([stats, pad], axis=1)      # lane-dense (TB, 128) store


# ---------------------------------------------------------------------------
# Host-side helpers (cached per shape; generation-aware tiling).
# ---------------------------------------------------------------------------
@functools.lru_cache(maxsize=None)
def _band_filter(n):
    """(n, n) 0/1 bf16 band matrix: 1 where |i - j| <= POOL_PAD."""
    idx = np.arange(n)
    band = np.abs(idx[:, None] - idx[None, :]) <= POOL_PAD
    return jnp.asarray(band, dtype=jnp.bfloat16)


def _vmem_capacity_bytes():
    try:
        return int(pltpu.get_tpu_info().vmem_capacity_bytes)
    except Exception:                      # interpret mode / older runtimes
        return 64 * 1024 * 1024            # v7x-sized conservative fallback


def _vmem_estimate(tb, h, w):
    slab = tb * h * w
    img = h * w
    return (2 * slab * 4                   # pred block, double-buffered f32
            + 2 * slab * 2                 # target block, double-buffered bf16
            + 2 * h * h * 2                # row band filter (bf16)
            + 2 * w * w * 2                # col band filter (bf16)
            + 2 * tb * OUT_LANES * 4       # packed output block
            + 12 * img * 4)                # in-flight per-image f32 temporaries


def _pick_tb(bc, h, w, budget):
    """Images per grid step: largest divisor of bc fitting the VMEM budget,
    short enough to unroll, and leaving >= 2 grid steps (both v7x TCs)."""
    best = 1
    for tb in range(1, bc + 1):
        if bc % tb:
            continue
        if tb > MAX_IMGS_PER_STEP:
            break
        if bc > 1 and bc // tb < 2:
            continue
        if _vmem_estimate(tb, h, w) <= budget:
            best = tb
    return best


def criterion_structure(pred, target):
    """Equivalent of CriterionStructure().forward(pred, target); NCHW inputs.

    `target` is streamed as bf16 — exact for the binary {0,1} masks this
    structure loss is defined for; soft labels would incur bf16 rounding
    relative to PyTorch's f32 avg_pool2d.
    """
    assert pred.shape == target.shape
    n, c, h, w = pred.shape
    bc = n * c

    cap = _vmem_capacity_bytes()
    tb = _pick_tb(bc, h, w, budget=int(cap * 0.70))
    g = bc // tb
    vmem_limit = max(32 * 1024 * 1024, int(cap * 0.75))

    pred3 = pred.reshape(bc, h, w).astype(jnp.float32)
    targ3 = target.reshape(bc, h, w).astype(jnp.bfloat16)

    rh = _band_filter(h)
    rw = _band_filter(w)

    stats = pl.pallas_call(
        _criterion_kernel,
        out_shape=jax.ShapeDtypeStruct((g, tb, OUT_LANES), jnp.float32),
        grid_spec=pltpu.PrefetchScalarGridSpec(
            num_scalar_prefetch=0,
            grid=(g,),
            in_specs=[
                pl.BlockSpec((tb, h, w), lambda i: (i, 0, 0)),   # pred block
                pl.BlockSpec((tb, h, w), lambda i: (i, 0, 0)),   # target block (bf16)
                pl.BlockSpec((h, h), lambda i: (0, 0)),          # row band filter (resident)
                pl.BlockSpec((w, w), lambda i: (0, 0)),          # col band filter (resident)
            ],
            out_specs=pl.BlockSpec((1, tb, OUT_LANES), lambda i: (i, 0, 0)),
        ),
        compiler_params=pltpu.CompilerParams(
            dimension_semantics=("parallel",),                   # independent steps
            vmem_limit_bytes=vmem_limit,
        ),
    )(pred3, targ3, rh, rw)

    stats = stats.reshape(bc, OUT_LANES)
    bce_sum = stats[:, 0]
    weit_sum = stats[:, 1]
    inter = stats[:, 2]
    union = stats[:, 3]

    # F.binary_cross_entropy_with_logits(..., reduce='none') -> legacy handling
    # resolves to reduction='mean', so wbce collapses to a scalar mean over all
    # pixels.  Keep the module's literal (weit_sum * scalar) / weit_sum
    # arithmetic (weit >= 1 everywhere so weit_sum > 0).
    total = jnp.float32(bc * h * w)
    wbce_scalar = jnp.sum(bce_sum) / total
    wbce = (weit_sum * wbce_scalar) / weit_sum          # (bc,)

    p_t = jnp.exp(-wbce)
    f_loss = (1.0 - p_t) ** GAMMA * wbce

    wiou = 1.0 - (inter + 1.0) / (union - inter + 1.0)

    return jnp.mean(1.0 * wbce + 0.8 * wiou + 0.05 * f_loss)


if __name__ == "__main__":
    key = jax.random.PRNGKey(0)
    k1, k2 = jax.random.split(key)
    pred = jax.random.normal(k1, (2, 4, 16, 16), dtype=jnp.float32)               # logits
    target = (jax.random.uniform(k2, (2, 4, 16, 16)) > 0.5).astype(jnp.float32)   # binary mask

    loss_fn = jax.jit(criterion_structure)
    loss = loss_fn(pred, target)
    jax.block_until_ready(loss)
    print("KERNEL_OK")
</pallas_src>

<mosaic_0001>
module attributes {stable_mosaic.version = 11 : i64} {
  func.func @_criterion_kernel(%arg0: i32, %arg1: memref<4x16x16xf32, #tpu.memory_space<vmem>>, %arg2: memref<4x16x16xbf16, #tpu.memory_space<vmem>>, %arg3: memref<16x16xbf16, #tpu.memory_space<vmem>>, %arg4: memref<16x16xbf16, #tpu.memory_space<vmem>>, %arg5: memref<1x4x128xf32, #tpu.memory_space<vmem>>) attributes {dimension_semantics = [#tpu.dimension_semantics<parallel>], iteration_bounds = array<i64: 2>, scalar_prefetch = 0 : i64, scratch_operands = 0 : i64, tpu.core_type = #tpu.core_type<tc>, window_params = [{transform_indices = @transform_0, window_bounds = array<i64: 4, 16, 16>}, {transform_indices = @transform_1, window_bounds = array<i64: 4, 16, 16>}, {pipeline_mode = #tpu.pipeline_mode<synchronous>, transform_indices = @transform_2, window_bounds = array<i64: 16, 16>}, {pipeline_mode = #tpu.pipeline_mode<synchronous>, transform_indices = @transform_3, window_bounds = array<i64: 16, 16>}, {transform_indices = @transform_4, window_bounds = array<i64: 1, 4, 128>}]} {
    %c0 = arith.constant 0 : index
    %c0_0 = arith.constant 0 : index
    %0 = vector.load %arg3[%c0, %c0_0] : memref<16x16xbf16, #tpu.memory_space<vmem>>, vector<16x16xbf16>
    %c0_1 = arith.constant 0 : index
    %c0_2 = arith.constant 0 : index
    %1 = vector.load %arg4[%c0_1, %c0_2] : memref<16x16xbf16, #tpu.memory_space<vmem>>, vector<16x16xbf16>
    %c0_3 = arith.constant 0 : index
    %c0_4 = arith.constant 0 : index
    %c0_5 = arith.constant 0 : index
    %2 = vector.load %arg1[%c0_3, %c0_4, %c0_5] : memref<4x16x16xf32, #tpu.memory_space<vmem>>, vector<1x16x16xf32>
    %3 = vector.shape_cast %2 : vector<1x16x16xf32> to vector<16x16xf32>
    %c0_6 = arith.constant 0 : index
    %c0_7 = arith.constant 0 : index
    %c0_8 = arith.constant 0 : index
    %4 = vector.load %arg2[%c0_6, %c0_7, %c0_8] : memref<4x16x16xbf16, #tpu.memory_space<vmem>>, vector<1x16x16xbf16>
    %5 = vector.shape_cast %4 : vector<1x16x16xbf16> to vector<16x16xbf16>
    %6 = arith.extf %5 : vector<16x16xbf16> to vector<16x16xf32>
    %cst = arith.constant dense<0.000000e+00> : vector<16x16xf32>
    %7 = tpu.matmul %0, %5, %cst {dimension_numbers = #tpu.dot_dimension_numbers<[1], [0], [0], [1], [0, 0, 1, 1], [], []>} : vector<16x16xbf16>, vector<16x16xbf16>, vector<16x16xf32> -> vector<16x16xf32>
    %8 = arith.truncf %7 : vector<16x16xf32> to vector<16x16xbf16>
    %cst_9 = arith.constant dense<0.000000e+00> : vector<16x16xf32>
    %9 = tpu.matmul %8, %1, %cst_9 {dimension_numbers = #tpu.dot_dimension_numbers<[1], [0], [0], [1], [0, 0, 1, 1], [], []>} : vector<16x16xbf16>, vector<16x16xbf16>, vector<16x16xf32> -> vector<16x16xf32>
    %cst_10 = arith.constant 0.00104058278 : f32
    %10 = vector.broadcast %cst_10 : f32 to vector<16x16xf32>
    %11 = arith.mulf %9, %10 : vector<16x16xf32>
    %12 = arith.subf %11, %6 : vector<16x16xf32>
    %13 = math.absf %12 : vector<16x16xf32>
    %cst_11 = arith.constant 5.000000e+00 : f32
    %14 = vector.broadcast %cst_11 : f32 to vector<16x16xf32>
    %15 = arith.mulf %14, %13 : vector<16x16xf32>
    %cst_12 = arith.constant 1.000000e+00 : f32
    %16 = vector.broadcast %cst_12 : f32 to vector<16x16xf32>
    %17 = arith.addf %16, %15 : vector<16x16xf32>
    %18 = math.absf %3 : vector<16x16xf32>
    %cst_13 = arith.constant 0.000000e+00 : f32
    %19 = vector.broadcast %cst_13 : f32 to vector<16x16xf32>
    %20 = arith.subf %19, %18 : vector<16x16xf32>
    %21 = math.exp %20 : vector<16x16xf32>
    %cst_14 = arith.constant 0.000000e+00 : f32
    %22 = vector.broadcast %cst_14 : f32 to vector<16x16xf32>
    %23 = arith.maximumf %3, %22 : vector<16x16xf32>
    %24 = arith.mulf %3, %6 : vector<16x16xf32>
    %25 = arith.subf %23, %24 : vector<16x16xf32>
    %cst_15 = arith.constant 1.000000e+00 : f32
    %26 = vector.broadcast %cst_15 : f32 to vector<16x16xf32>
    %27 = arith.addf %26, %21 : vector<16x16xf32>
    %28 = math.log %27 : vector<16x16xf32>
    %29 = arith.addf %25, %28 : vector<16x16xf32>
    %cst_16 = arith.constant 1.000000e+00 : f32
    %30 = vector.broadcast %cst_16 : f32 to vector<16x16xf32>
    %31 = arith.addf %30, %21 : vector<16x16xf32>
    %cst_17 = arith.constant 1.000000e+00 : f32
    %32 = vector.broadcast %cst_17 : f32 to vector<16x16xf32>
    %33 = arith.divf %32, %31 : vector<16x16xf32>
    %cst_18 = arith.constant 0.000000e+00 : f32
    %34 = vector.broadcast %cst_18 : f32 to vector<16x16xf32>
    %35 = arith.cmpf oge, %3, %34 : vector<16x16xf32>
    %cst_19 = arith.constant 1.000000e+00 : f32
    %36 = vector.broadcast %cst_19 : f32 to vector<16x16xf32>
    %37 = arith.select %35, %36, %21 : vector<16x16xi1>, vector<16x16xf32>
    %38 = arith.mulf %37, %33 : vector<16x16xf32>
    %cst_20 = arith.constant dense<0.000000e+00> : vector<16xf32>
    %39 = vector.multi_reduction <add>, %29, %cst_20 [1] : vector<16x16xf32> to vector<16xf32>
    %40 = vector.shape_cast %39 : vector<16xf32> to vector<16x1xf32>
    %cst_21 = arith.constant dense<0.000000e+00> : vector<16xf32>
    %41 = vector.multi_reduction <add>, %17, %cst_21 [1] : vector<16x16xf32> to vector<16xf32>
    %42 = vector.shape_cast %41 : vector<16xf32> to vector<16x1xf32>
    %43 = arith.mulf %38, %6 : vector<16x16xf32>
    %44 = arith.mulf %43, %17 : vector<16x16xf32>
    %cst_22 = arith.constant dense<0.000000e+00> : vector<16xf32>
    %45 = vector.multi_reduction <add>, %44, %cst_22 [1] : vector<16x16xf32> to vector<16xf32>
    %46 = vector.shape_cast %45 : vector<16xf32> to vector<16x1xf32>
    %47 = arith.addf %38, %6 : vector<16x16xf32>
    %48 = arith.mulf %47, %17 : vector<16x16xf32>
    %cst_23 = arith.constant dense<0.000000e+00> : vector<16xf32>
    %49 = vector.multi_reduction <add>, %48, %cst_23 [1] : vector<16x16xf32> to vector<16xf32>
    %50 = vector.shape_cast %49 : vector<16xf32> to vector<16x1xf32>
    %51 = tpu.concatenate %40, %42, %46, %50 in 1 : vector<16x1xf32>, vector<16x1xf32>, vector<16x1xf32>, vector<16x1xf32> -> vector<16x4xf32>
    %cst_24 = arith.constant dense<0.000000e+00> : vector<4xf32>
    %52 = vector.multi_reduction <add>, %51, %cst_24 [0] : vector<16x4xf32> to vector<4xf32>
    %53 = vector.shape_cast %52 : vector<4xf32> to vector<1x4xf32>
    %c1 = arith.constant 1 : index
    %c0_25 = arith.constant 0 : index
    %c0_26 = arith.constant 0 : index
    %54 = vector.load %arg1[%c1, %c0_25, %c0_26] : memref<4x16x16xf32, #tpu.memory_space<vmem>>, vector<1x16x16xf32>
    %55 = vector.shape_cast %54 : vector<1x16x16xf32> to vector<16x16xf32>
    %c1_27 = arith.constant 1 : index
    %c0_28 = arith.constant 0 : index
    %c0_29 = arith.constant 0 : index
    %56 = vector.load %arg2[%c1_27, %c0_28, %c0_29] : memref<4x16x16xbf16, #tpu.memory_space<vmem>>, vector<1x16x16xbf16>
    %57 = vector.shape_cast %56 : vector<1x16x16xbf16> to vector<16x16xbf16>
    %58 = arith.extf %57 : vector<16x16xbf16> to vector<16x16xf32>
    %cst_30 = arith.constant dense<0.000000e+00> : vector<16x16xf32>
    %59 = tpu.matmul %0, %57, %cst_30 {dimension_numbers = #tpu.dot_dimension_numbers<[1], [0], [0], [1], [0, 0, 1, 1], [], []>} : vector<16x16xbf16>, vector<16x16xbf16>, vector<16x16xf32> -> vector<16x16xf32>
    %60 = arith.truncf %59 : vector<16x16xf32> to vector<16x16xbf16>
    %cst_31 = arith.constant dense<0.000000e+00> : vector<16x16xf32>
    %61 = tpu.matmul %60, %1, %cst_31 {dimension_numbers = #tpu.dot_dimension_numbers<[1], [0], [0], [1], [0, 0, 1, 1], [], []>} : vector<16x16xbf16>, vector<16x16xbf16>, vector<16x16xf32> -> vector<16x16xf32>
    %cst_32 = arith.constant 0.00104058278 : f32
    %62 = vector.broadcast %cst_32 : f32 to vector<16x16xf32>
    %63 = arith.mulf %61, %62 : vector<16x16xf32>
    %64 = arith.subf %63, %58 : vector<16x16xf32>
    %65 = math.absf %64 : vector<16x16xf32>
    %cst_33 = arith.constant 5.000000e+00 : f32
    %66 = vector.broadcast %cst_33 : f32 to vector<16x16xf32>
    %67 = arith.mulf %66, %65 : vector<16x16xf32>
    %cst_34 = arith.constant 1.000000e+00 : f32
    %68 = vector.broadcast %cst_34 : f32 to vector<16x16xf32>
    %69 = arith.addf %68, %67 : vector<16x16xf32>
    %70 = math.absf %55 : vector<16x16xf32>
    %cst_35 = arith.constant 0.000000e+00 : f32
    %71 = vector.broadcast %cst_35 : f32 to vector<16x16xf32>
    %72 = arith.subf %71, %70 : vector<16x16xf32>
    %73 = math.exp %72 : vector<16x16xf32>
    %cst_36 = arith.constant 0.000000e+00 : f32
    %74 = vector.broadcast %cst_36 : f32 to vector<16x16xf32>
    %75 = arith.maximumf %55, %74 : vector<16x16xf32>
    %76 = arith.mulf %55, %58 : vector<16x16xf32>
    %77 = arith.subf %75, %76 : vector<16x16xf32>
    %cst_37 = arith.constant 1.000000e+00 : f32
    %78 = vector.broadcast %cst_37 : f32 to vector<16x16xf32>
    %79 = arith.addf %78, %73 : vector<16x16xf32>
    %80 = math.log %79 : vector<16x16xf32>
    %81 = arith.addf %77, %80 : vector<16x16xf32>
    %cst_38 = arith.constant 1.000000e+00 : f32
    %82 = vector.broadcast %cst_38 : f32 to vector<16x16xf32>
    %83 = arith.addf %82, %73 : vector<16x16xf32>
    %cst_39 = arith.constant 1.000000e+00 : f32
    %84 = vector.broadcast %cst_39 : f32 to vector<16x16xf32>
    %85 = arith.divf %84, %83 : vector<16x16xf32>
    %cst_40 = arith.constant 0.000000e+00 : f32
    %86 = vector.broadcast %cst_40 : f32 to vector<16x16xf32>
    %87 = arith.cmpf oge, %55, %86 : vector<16x16xf32>
    %cst_41 = arith.constant 1.000000e+00 : f32
    %88 = vector.broadcast %cst_41 : f32 to vector<16x16xf32>
    %89 = arith.select %87, %88, %73 : vector<16x16xi1>, vector<16x16xf32>
    %90 = arith.mulf %89, %85 : vector<16x16xf32>
    %cst_42 = arith.constant dense<0.000000e+00> : vector<16xf32>
    %91 = vector.multi_reduction <add>, %81, %cst_42 [1] : vector<16x16xf32> to vector<16xf32>
    %92 = vector.shape_cast %91 : vector<16xf32> to vector<16x1xf32>
    %cst_43 = arith.constant dense<0.000000e+00> : vector<16xf32>
    %93 = vector.multi_reduction <add>, %69, %cst_43 [1] : vector<16x16xf32> to vector<16xf32>
    %94 = vector.shape_cast %93 : vector<16xf32> to vector<16x1xf32>
    %95 = arith.mulf %90, %58 : vector<16x16xf32>
    %96 = arith.mulf %95, %69 : vector<16x16xf32>
    %cst_44 = arith.constant dense<0.000000e+00> : vector<16xf32>
    %97 = vector.multi_reduction <add>, %96, %cst_44 [1] : vector<16x16xf32> to vector<16xf32>
    %98 = vector.shape_cast %97 : vector<16xf32> to vector<16x1xf32>
    %99 = arith.addf %90, %58 : vector<16x16xf32>
    %100 = arith.mulf %99, %69 : vector<16x16xf32>
    %cst_45 = arith.constant dense<0.000000e+00> : vector<16xf32>
    %101 = vector.multi_reduction <add>, %100, %cst_45 [1] : vector<16x16xf32> to vector<16xf32>
    %102 = vector.shape_cast %101 : vector<16xf32> to vector<16x1xf32>
    %103 = tpu.concatenate %92, %94, %98, %102 in 1 : vector<16x1xf32>, vector<16x1xf32>, vector<16x1xf32>, vector<16x1xf32> -> vector<16x4xf32>
    %cst_46 = arith.constant dense<0.000000e+00> : vector<4xf32>
    %104 = vector.multi_reduction <add>, %103, %cst_46 [0] : vector<16x4xf32> to vector<4xf32>
    %105 = vector.shape_cast %104 : vector<4xf32> to vector<1x4xf32>
    %c2 = arith.constant 2 : index
    %c0_47 = arith.constant 0 : index
    %c0_48 = arith.constant 0 : index
    %106 = vector.load %arg1[%c2, %c0_47, %c0_48] : memref<4x16x16xf32, #tpu.memory_space<vmem>>, vector<1x16x16xf32>
    %107 = vector.shape_cast %106 : vector<1x16x16xf32> to vector<16x16xf32>
    %c2_49 = arith.constant 2 : index
    %c0_50 = arith.constant 0 : index
    %c0_51 = arith.constant 0 : index
    %108 = vector.load %arg2[%c2_49, %c0_50, %c0_51] : memref<4x16x16xbf16, #tpu.memory_space<vmem>>, vector<1x16x16xbf16>
    %109 = vector.shape_cast %108 : vector<1x16x16xbf16> to vector<16x16xbf16>
    %110 = arith.extf %109 : vector<16x16xbf16> to vector<16x16xf32>
    %cst_52 = arith.constant dense<0.000000e+00> : vector<16x16xf32>
    %111 = tpu.matmul %0, %109, %cst_52 {dimension_numbers = #tpu.dot_dimension_numbers<[1], [0], [0], [1], [0, 0, 1, 1], [], []>} : vector<16x16xbf16>, vector<16x16xbf16>, vector<16x16xf32> -> vector<16x16xf32>
    %112 = arith.truncf %111 : vector<16x16xf32> to vector<16x16xbf16>
    %cst_53 = arith.constant dense<0.000000e+00> : vector<16x16xf32>
    %113 = tpu.matmul %112, %1, %cst_53 {dimension_numbers = #tpu.dot_dimension_numbers<[1], [0], [0], [1], [0, 0, 1, 1], [], []>} : vector<16x16xbf16>, vector<16x16xbf16>, vector<16x16xf32> -> vector<16x16xf32>
    %cst_54 = arith.constant 0.00104058278 : f32
    %114 = vector.broadcast %cst_54 : f32 to vector<16x16xf32>
    %115 = arith.mulf %113, %114 : vector<16x16xf32>
    %116 = arith.subf %115, %110 : vector<16x16xf32>
    %117 = math.absf %116 : vector<16x16xf32>
    %cst_55 = arith.constant 5.000000e+00 : f32
    %118 = vector.broadcast %cst_55 : f32 to vector<16x16xf32>
    %119 = arith.mulf %118, %117 : vector<16x16xf32>
    %cst_56 = arith.constant 1.000000e+00 : f32
    %120 = vector.broadcast %cst_56 : f32 to vector<16x16xf32>
    %121 = arith.addf %120, %119 : vector<16x16xf32>
    %122 = math.absf %107 : vector<16x16xf32>
    %cst_57 = arith.constant 0.000000e+00 : f32
    %123 = vector.broadcast %cst_57 : f32 to vector<16x16xf32>
    %124 = arith.subf %123, %122 : vector<16x16xf32>
    %125 = math.exp %124 : vector<16x16xf32>
    %cst_58 = arith.constant 0.000000e+00 : f32
    %126 = vector.broadcast %cst_58 : f32 to vector<16x16xf32>
    %127 = arith.maximumf %107, %126 : vector<16x16xf32>
    %128 = arith.mulf %107, %110 : vector<16x16xf32>
    %129 = arith.subf %127, %128 : vector<16x16xf32>
    %cst_59 = arith.constant 1.000000e+00 : f32
    %130 = vector.broadcast %cst_59 : f32 to vector<16x16xf32>
    %131 = arith.addf %130, %125 : vector<16x16xf32>
    %132 = math.log %131 : vector<16x16xf32>
    %133 = arith.addf %129, %132 : vector<16x16xf32>
    %cst_60 = arith.constant 1.000000e+00 : f32
    %134 = vector.broadcast %cst_60 : f32 to vector<16x16xf32>
    %135 = arith.addf %134, %125 : vector<16x16xf32>
    %cst_61 = arith.constant 1.000000e+00 : f32
    %136 = vector.broadcast %cst_61 : f32 to vector<16x16xf32>
    %137 = arith.divf %136, %135 : vector<16x16xf32>
    %cst_62 = arith.constant 0.000000e+00 : f32
    %138 = vector.broadcast %cst_62 : f32 to vector<16x16xf32>
    %139 = arith.cmpf oge, %107, %138 : vector<16x16xf32>
    %cst_63 = arith.constant 1.000000e+00 : f32
    %140 = vector.broadcast %cst_63 : f32 to vector<16x16xf32>
    %141 = arith.select %139, %140, %125 : vector<16x16xi1>, vector<16x16xf32>
    %142 = arith.mulf %141, %137 : vector<16x16xf32>
    %cst_64 = arith.constant dense<0.000000e+00> : vector<16xf32>
    %143 = vector.multi_reduction <add>, %133, %cst_64 [1] : vector<16x16xf32> to vector<16xf32>
    %144 = vector.shape_cast %143 : vector<16xf32> to vector<16x1xf32>
    %cst_65 = arith.constant dense<0.000000e+00> : vector<16xf32>
    %145 = vector.multi_reduction <add>, %121, %cst_65 [1] : vector<16x16xf32> to vector<16xf32>
    %146 = vector.shape_cast %145 : vector<16xf32> to vector<16x1xf32>
    %147 = arith.mulf %142, %110 : vector<16x16xf32>
    %148 = arith.mulf %147, %121 : vector<16x16xf32>
    %cst_66 = arith.constant dense<0.000000e+00> : vector<16xf32>
    %149 = vector.multi_reduction <add>, %148, %cst_66 [1] : vector<16x16xf32> to vector<16xf32>
    %150 = vector.shape_cast %149 : vector<16xf32> to vector<16x1xf32>
    %151 = arith.addf %142, %110 : vector<16x16xf32>
    %152 = arith.mulf %151, %121 : vector<16x16xf32>
    %cst_67 = arith.constant dense<0.000000e+00> : vector<16xf32>
    %153 = vector.multi_reduction <add>, %152, %cst_67 [1] : vector<16x16xf32> to vector<16xf32>
    %154 = vector.shape_cast %153 : vector<16xf32> to vector<16x1xf32>
    %155 = tpu.concatenate %144, %146, %150, %154 in 1 : vector<16x1xf32>, vector<16x1xf32>, vector<16x1xf32>, vector<16x1xf32> -> vector<16x4xf32>
    %cst_68 = arith.constant dense<0.000000e+00> : vector<4xf32>
    %156 = vector.multi_reduction <add>, %155, %cst_68 [0] : vector<16x4xf32> to vector<4xf32>
    %157 = vector.shape_cast %156 : vector<4xf32> to vector<1x4xf32>
    %c3 = arith.constant 3 : index
    %c0_69 = arith.constant 0 : index
    %c0_70 = arith.constant 0 : index
    %158 = vector.load %arg1[%c3, %c0_69, %c0_70] : memref<4x16x16xf32, #tpu.memory_space<vmem>>, vector<1x16x16xf32>
    %159 = vector.shape_cast %158 : vector<1x16x16xf32> to vector<16x16xf32>
    %c3_71 = arith.constant 3 : index
    %c0_72 = arith.constant 0 : index
    %c0_73 = arith.constant 0 : index
    %160 = vector.load %arg2[%c3_71, %c0_72, %c0_73] : memref<4x16x16xbf16, #tpu.memory_space<vmem>>, vector<1x16x16xbf16>
    %161 = vector.shape_cast %160 : vector<1x16x16xbf16> to vector<16x16xbf16>
    %162 = arith.extf %161 : vector<16x16xbf16> to vector<16x16xf32>
    %cst_74 = arith.constant dense<0.000000e+00> : vector<16x16xf32>
    %163 = tpu.matmul %0, %161, %cst_74 {dimension_numbers = #tpu.dot_dimension_numbers<[1], [0], [0], [1], [0, 0, 1, 1], [], []>} : vector<16x16xbf16>, vector<16x16xbf16>, vector<16x16xf32> -> vector<16x16xf32>
    %164 = arith.truncf %163 : vector<16x16xf32> to vector<16x16xbf16>
    %cst_75 = arith.constant dense<0.000000e+00> : vector<16x16xf32>
    %165 = tpu.matmul %164, %1, %cst_75 {dimension_numbers = #tpu.dot_dimension_numbers<[1], [0], [0], [1], [0, 0, 1, 1], [], []>} : vector<16x16xbf16>, vector<16x16xbf16>, vector<16x16xf32> -> vector<16x16xf32>
    %cst_76 = arith.constant 0.00104058278 : f32
    %166 = vector.broadcast %cst_76 : f32 to vector<16x16xf32>
    %167 = arith.mulf %165, %166 : vector<16x16xf32>
    %168 = arith.subf %167, %162 : vector<16x16xf32>
    %169 = math.absf %168 : vector<16x16xf32>
    %cst_77 = arith.constant 5.000000e+00 : f32
    %170 = vector.broadcast %cst_77 : f32 to vector<16x16xf32>
    %171 = arith.mulf %170, %169 : vector<16x16xf32>
    %cst_78 = arith.constant 1.000000e+00 : f32
    %172 = vector.broadcast %cst_78 : f32 to vector<16x16xf32>
    %173 = arith.addf %172, %171 : vector<16x16xf32>
    %174 = math.absf %159 : vector<16x16xf32>
    %cst_79 = arith.constant 0.000000e+00 : f32
    %175 = vector.broadcast %cst_79 : f32 to vector<16x16xf32>
    %176 = arith.subf %175, %174 : vector<16x16xf32>
    %177 = math.exp %176 : vector<16x16xf32>
    %cst_80 = arith.constant 0.000000e+00 : f32
    %178 = vector.broadcast %cst_80 : f32 to vector<16x16xf32>
    %179 = arith.maximumf %159, %178 : vector<16x16xf32>
    %180 = arith.mulf %159, %162 : vector<16x16xf32>
    %181 = arith.subf %179, %180 : vector<16x16xf32>
    %cst_81 = arith.constant 1.000000e+00 : f32
    %182 = vector.broadcast %cst_81 : f32 to vector<16x16xf32>
    %183 = arith.addf %182, %177 : vector<16x16xf32>
    %184 = math.log %183 : vector<16x16xf32>
    %185 = arith.addf %181, %184 : vector<16x16xf32>
    %cst_82 = arith.constant 1.000000e+00 : f32
    %186 = vector.broadcast %cst_82 : f32 to vector<16x16xf32>
    %187 = arith.addf %186, %177 : vector<16x16xf32>
    %cst_83 = arith.constant 1.000000e+00 : f32
    %188 = vector.broadcast %cst_83 : f32 to vector<16x16xf32>
    %189 = arith.divf %188, %187 : vector<16x16xf32>
    %cst_84 = arith.constant 0.000000e+00 : f32
    %190 = vector.broadcast %cst_84 : f32 to vector<16x16xf32>
    %191 = arith.cmpf oge, %159, %190 : vector<16x16xf32>
    %cst_85 = arith.constant 1.000000e+00 : f32
    %192 = vector.broadcast %cst_85 : f32 to vector<16x16xf32>
    %193 = arith.select %191, %192, %177 : vector<16x16xi1>, vector<16x16xf32>
    %194 = arith.mulf %193, %189 : vector<16x16xf32>
    %cst_86 = arith.constant dense<0.000000e+00> : vector<16xf32>
    %195 = vector.multi_reduction <add>, %185, %cst_86 [1] : vector<16x16xf32> to vector<16xf32>
    %196 = vector.shape_cast %195 : vector<16xf32> to vector<16x1xf32>
    %cst_87 = arith.constant dense<0.000000e+00> : vector<16xf32>
    %197 = vector.multi_reduction <add>, %173, %cst_87 [1] : vector<16x16xf32> to vector<16xf32>
    %198 = vector.shape_cast %197 : vector<16xf32> to vector<16x1xf32>
    %199 = arith.mulf %194, %162 : vector<16x16xf32>
    %200 = arith.mulf %199, %173 : vector<16x16xf32>
    %cst_88 = arith.constant dense<0.000000e+00> : vector<16xf32>
    %201 = vector.multi_reduction <add>, %200, %cst_88 [1] : vector<16x16xf32> to vector<16xf32>
    %202 = vector.shape_cast %201 : vector<16xf32> to vector<16x1xf32>
    %203 = arith.addf %194, %162 : vector<16x16xf32>
    %204 = arith.mulf %203, %173 : vector<16x16xf32>
    %cst_89 = arith.constant dense<0.000000e+00> : vector<16xf32>
    %205 = vector.multi_reduction <add>, %204, %cst_89 [1] : vector<16x16xf32> to vector<16xf32>
    %206 = vector.shape_cast %205 : vector<16xf32> to vector<16x1xf32>
    %207 = tpu.concatenate %196, %198, %202, %206 in 1 : vector<16x1xf32>, vector<16x1xf32>, vector<16x1xf32>, vector<16x1xf32> -> vector<16x4xf32>
    %cst_90 = arith.constant dense<0.000000e+00> : vector<4xf32>
    %208 = vector.multi_reduction <add>, %207, %cst_90 [0] : vector<16x4xf32> to vector<4xf32>
    %209 = vector.shape_cast %208 : vector<4xf32> to vector<1x4xf32>
    %210 = tpu.concatenate %53, %105, %157, %209 in 0 : vector<1x4xf32>, vector<1x4xf32>, vector<1x4xf32>, vector<1x4xf32> -> vector<4x4xf32>
    %cst_91 = arith.constant 0.000000e+00 : f32
    %211 = vector.broadcast %cst_91 : f32 to vector<4x124xf32>
    %212 = tpu.concatenate %210, %211 in 1 : vector<4x4xf32>, vector<4x124xf32> -> vector<4x128xf32>
    %c0_92 = arith.constant 0 : index
    %c0_93 = arith.constant 0 : index
    %c0_94 = arith.constant 0 : index
    %213 = vector.load %arg5[%c0_92, %c0_93, %c0_94] : memref<1x4x128xf32, #tpu.memory_space<vmem>>, vector<1x4x128xf32>
    %214 = vector.shape_cast %213 : vector<1x4x128xf32> to vector<4x128xf32>
    %215 = vector.shape_cast %212 : vector<4x128xf32> to vector<1x4x128xf32>
    tpu.vector_store %arg5[%c0_92, %c0_93, %c0_94], %215 {strides = array<i32>} : memref<1x4x128xf32, #tpu.memory_space<vmem>>, vector<1x4x128xf32>,
    return
  }
  func.func @transform_0(%arg0: i32) -> (i32, i32, i32) {
    %c0_i32 = arith.constant 0 : i32
    %c0_i32_0 = arith.constant 0 : i32
    %c0_i32_1 = arith.constant 0 : i32
    return %arg0, %c0_i32, %c0_i32_0 : i32, i32, i32
  }
  func.func @transform_1(%arg0: i32) -> (i32, i32, i32) {
    %c0_i32 = arith.constant 0 : i32
    %c0_i32_0 = arith.constant 0 : i32
    %c0_i32_1 = arith.constant 0 : i32
    return %arg0, %c0_i32, %c0_i32_0 : i32, i32, i32
  }
  func.func @transform_2(%arg0: i32) -> (i32, i32) {
    %c0_i32 = arith.constant 0 : i32
    %c0_i32_0 = arith.constant 0 : i32
    %c0_i32_1 = arith.constant 0 : i32
    return %c0_i32, %c0_i32_0 : i32, i32
  }
  func.func @transform_3(%arg0: i32) -> (i32, i32) {
    %c0_i32 = arith.constant 0 : i32
    %c0_i32_0 = arith.constant 0 : i32
    %c0_i32_1 = arith.constant 0 : i32
    return %c0_i32, %c0_i32_0 : i32, i32
  }
  func.func @transform_4(%arg0: i32) -> (i32, i32, i32) {
    %c0_i32 = arith.constant 0 : i32
    %c0_i32_0 = arith.constant 0 : i32
    %c0_i32_1 = arith.constant 0 : i32
    return %arg0, %c0_i32, %c0_i32_0 : i32, i32, i32
  }
}

</mosaic_0001>

<bundles_post_ra>
// kernel: criterion_structure.1
= control target key start
LH: loop header
LB: loop body
LE: loop exit
PB: predicated region body
PF: predicated region fallthrough
CT: control target
= control target key end

     0   :  { %s1286_s15 = smov 0   ;;  %s1632_s0 = inlined_call_operand.vmem [shape: f32[8,16,16], index: 0, kind: input, shape index: {}]   ;;  %s1633_s1 = inlined_call_operand.vmem [shape: bf16[8,16,16], index: 1, kind: input, shape index: {}]   ;;  %s1634_s2 = inlined_call_operand.vmem [shape: bf16[16,16], index: 2, kind: input, shape index: {}, may-alias: {2,3}]   ;;  %s1635_s3 = inlined_call_operand.vmem [shape: bf16[16,16], index: 3, kind: input, shape index: {}, may-alias: {2,3}]   ;;  %s1636_s4 = inlined_call_operand.vmem [shape: f32[2,4,128], index: 4, kind: output, shape index: {}]  }
   0x1 LB: > { %s1292_s16 = sadd.s32 4294967295, %s1257_s15   ;;  %p1081_p0 = scmp.ge.s32.totalorder %s1257_s15, 1  ;;  %s1257_s15 = sphi %s1286_s15, %s14_s15  }
   0x2   : > { %p176_p1 = scmp.lt.s32.totalorder %s1257_s15, 3 }
   0x4   : > { %p177_p2 = pnand %p1081_p0, %p176_p1 }
   0x5   : > { %s1082_s17 = sshll.u32 (!%p177_p2), %s1292_s16, 2  ;;  %v1259_v0 = vmov (!%p177_p2), 0.0   ;;  %vm1260_vm0 = vmmov (!%p177_p2), 0   ;;  %v1194_v3 = vld [vmem:[%s1634_s2] sm:$0xff] (!%p177_p2)   ;;  %vm248_vm1 = vcmask (!%p177_p2), 130048   ;;  %vm418_vm10 = vcmask (!%p177_p2), 7168  }
   0x6   : > { %180 = sbr.rel (%p177_p2) target bundleno = 668 (0x29c), region = 36  ;;  %1135 = vmatprep.subr.bf16.mxu0 (!%p177_p2), %v1259_v0  ;;  %p209_p3 = scmp.lt.s32.totalorder (!%p177_p2), %s1082_s17, 7  ;;  %1137 = vmatprep.mubr.msk.bf16.mxu0 (!%p177_p2), %vm1260_vm0, %v1259_v0  ;;  %v1334_v6 = vld [vmem:[%s1635_s3] sm:$0xff] (!%p177_p2)   ;;  %vm421_vm11 = vcmask (!%p177_p2), 15360   ;;  %vm424_vm12 = vcmask (!%p177_p2), 23552   ;;  %vm427_vm13 = vcmask (!%p177_p2), 31744  }
   0x7   : > { %1141 = vmatprep.subr.bf16.mxu1 (!%p177_p2), %v1259_v0  ;;  %1143 = vmatprep.mubr.msk.bf16.mxu1 (!%p177_p2), %vm1260_vm0, %v1259_v0  ;;  %p222_p4 = scmp.lt.s32.totalorder (!%p177_p2), %s1292_s16, 1  ;;  %vm1004_vm14 = vcmask (!%p177_p2), 1040384   ;;  %vm1006_vm15 = vcmask (!%p177_p2), 1041408  }
   0x8   : > { %1142 = vmatpush3.bf16.msra.mxu1 (!%p177_p2), %v1334_v6 }
   0x9   : > { %1153 = vmatprep.subr.bf16.mxu1 (!%p177_p2), %v1259_v0 }
   0xd   : > { %s1638_s17 = smov (!%p209_p3, %s1082_s17), 7  ;;  %s1640_s16 = smov (!%p222_p4, %s1292_s16), 1 }
   0xe   : > { %s1118_s18 = sshll.u32 %s1638_s17, 3  ;;  %s1117_s26 = sshll.u32 %s1638_s17, 4 }
   0xf   : > { %s220_s21 = scalar_lea.vmem %s1633_s1, %s1118_s18  ;;  %s1341_s29 = scalar_lea.vmem %s1632_s0, %s1117_s26 }
  0x10   : > { %v233_v1 = vld [vmem:[%s220_s21] sm:$0xff]   ;;  %v1306_v2 = vld [vmem:[%s220_s21 + $0x8] sm:$0xff]   ;;  %v1317_v4 = vld [vmem:[%s220_s21 + $0x10] sm:$0xff]   ;;  %s1088_s30 = sshll.u32 %s1640_s16, 2 }
  0x11   : > { %1136 = vmatpush3.bf16.msra.mxu0 %v233_v1  ;;  %v1324_v5 = vld [vmem:[%s220_s21 + $0x18] sm:$0xff]   ;;  %v1344_v7 = vld [vmem:[%s1341_s29] sm:$0xff]  ;;  %v1347_v8 = vld [vmem:[%s1341_s29 + $0x8] sm:$0xff]  ;;  %v1362_v19 = vunpack.c.l.bf16 %v233_v1  ;;  %v1365_v20 = vunpack.c.h.bf16 %v233_v1  ;;  %s225_s7 = scalar_lea.vmem %s1636_s4, %s1088_s30 }
  0x12   : > { %1147 = vmatprep.subr.bf16.mxu0 %v1259_v0  ;;  %v354_v9 = vand.u32 2147483647, %v1344_v7  ;;  %v355_v10 = vand.u32 2147483647, %v1347_v8  ;;  %v362_v21 = vmax.f32 %v1344_v7, 0.0  ;;  %v363_v23 = vmax.f32 %v1347_v8, 0.0 }
  0x13   : > { %v364_v22 = vmul.f32 %v1362_v19, %v1344_v7  ;;  %v365_v24 = vmul.f32 %v1365_v20, %v1347_v8  ;;  %v1391_v55 = vld [vmem:[%s1341_s29 + $0x18] sm:$0xff]  ;;  %v1395_v57 = vld [vmem:[%s1341_s29 + $0x10] sm:$0xff]  ;;  %v1399_v60 = vld [vmem:[%s1341_s29 + $0x28] sm:$0xff]  ;;  %vm380_vm8 = vcmp.ge.f32.partialorder %v1344_v7, 0.0  ;;  %vm381_vm9 = vcmp.ge.f32.partialorder %v1347_v8, 0.0 }
  0x14   : > { %1138 = vmatmul.mubr.msk.bf16.vlgmr.msra.gmra.mrb[0].mxu0 %vm248_vm1, %v1194_v3  ;;  %v356_v11 = vsub.f32 0.0, %v354_v9  ;;  %v357_v12 = vsub.f32 0.0, %v355_v10  ;;  %v548_v56 = vand.u32 2147483647, %v1391_v55  ;;  %v547_v59 = vand.u32 2147483647, %v1395_v57 }
  0x15   : > { %1148 = vmatpush3.bf16.msra.mxu0 %v1306_v2  ;;  %1149 = vmatprep.mubr.msk.bf16.mxu0 %vm1260_vm0, %v1259_v0  ;;  %v366_v25 = vsub.f32 %v362_v21, %v364_v22  ;;  %v367_v28 = vsub.f32 %v363_v23, %v365_v24  ;;  %v737_v63 = vand.u32 2147483647, %v1399_v60  ;;  %v1407_v9 = vld [vmem:[%s1341_s29 + $0x38] sm:$0xff]  ;;  %vm573_vm2 = vcmp.ge.f32.partialorder %v1395_v57, 0.0 }
  0x16   : > { %1159 = vmatprep.subr.bf16.mxu0 %v1259_v0  ;;  %v358_v13 = vmul.f32 1.442695, %v356_v11  ;;  %v360_v14 = vmul.f32 1.442695, %v357_v12  ;;  %v550_v58 = vsub.f32 0.0, %v548_v56  ;;  %v549_v62 = vsub.f32 0.0, %v547_v59 }
  0x17   : > { %v926_v12 = vand.u32 2147483647, %v1407_v9  ;;  %v1473_v56 = vunpack.c.l.bf16 %v1324_v5  ;;  %vm574_vm3 = vcmp.ge.f32.partialorder %v1391_v55, 0.0  ;;  %vm763_vm5 = vcmp.ge.f32.partialorder %v1399_v60, 0.0 }
  0x18   : > { %1203 = vpow2.f32 %v358_v13  ;;  %v553_v61 = vmul.f32 1.442695, %v550_v58  ;;  %v551_v1 = vmul.f32 1.442695, %v549_v62  ;;  %v1411_v13 = vld [vmem:[%s1341_s29 + $0x30] sm:$0xff]  ;;  %vm952_vm7 = vcmp.ge.f32.partialorder %v1407_v9, 0.0 }
  0x19   : > { %1205 = vpow2.f32 %v360_v14  ;;  %v928_v21 = vsub.f32 0.0, %v926_v12  ;;  %v925_v22 = vand.u32 2147483647, %v1411_v13  ;;  %vm951_vm6 = vcmp.ge.f32.partialorder %v1411_v13, 0.0 }
  0x1b   : > { %v931_v23 = vmul.f32 1.442695, %v928_v21  ;;  %v927_v24 = vsub.f32 0.0, %v925_v22 }
  0x1c   : > { %1150 = vmatmul.mubr.msk.bf16.vlgmr.msra.gmra.mrb[4].mxu0 %vm248_vm1, %v1194_v3 }
  0x1d   : > { %1160 = vmatpush3.bf16.msra.mxu0 %v1317_v4  ;;  %1161 = vmatprep.mubr.msk.bf16.mxu0 %vm1260_vm0, %v1259_v0 }
  0x1e   : > { %1171 = vmatprep.subr.bf16.mxu0 %v1259_v0 }
  0x22   : > { %v1351_v15 = vpop.eup %1203 }
  0x23   : > { %v1353_v16 = vpop.eup %1205  ;;  %v1356_v17 = vadd.f32 1.0, %v1351_v15 }
  0x24   : > { %1162 = vmatmul.mubr.msk.bf16.vlgmr.msra.gmra.mrb[8].mxu0 %vm248_vm1, %v1194_v3  ;;  %v1359_v18 = vadd.f32 1.0, %v1353_v16 }
  0x25   : > { %1172 = vmatpush3.bf16.msra.mxu0 %v1324_v5  ;;  %1173 = vmatprep.mubr.msk.bf16.mxu0 %vm1260_vm0, %v1259_v0  ;;  %1207 = vlog2.f32 %v1356_v17 }
  0x26   : > { %1209 = vlog2.f32 %v1359_v18 }
  0x27   : > { %1211 = vpow2.f32 %v553_v61 }
  0x28   : > { %1213 = vpow2.f32 %v551_v1 }
  0x2c   : > { %1174 = vmatmul.mubr.msk.bf16.vlgmr.msra.gmra.mrb[12].mxu0 %vm248_vm1, %v1194_v3  ;;  %v739_v3 = vsub.f32 0.0, %v737_v63 }
  0x2e   : > { %v742_v10 = vmul.f32 1.442695, %v739_v3 }
  0x2f   : > { %v1208_v26 = vpop.eup %1207 }
  0x30   : > { %v371_v27 = vmul.f32 0.6931472, %v1208_v26  ;;  %v1210_v29 = vpop.eup %1209  ;;  %1215 = vpow2.f32 %v742_v10 }
  0x31   : > { %v373_v31 = vmul.f32 0.6931472, %v1210_v29  ;;  %v1414_v26 = vpop.eup %1211 }
  0x32   : > { %v374_v30 = vadd.f32 %v371_v27, %v366_v25  ;;  %v929_v25 = vmul.f32 1.442695, %v927_v24  ;;  %v1417_v27 = vadd.f32 1.0, %v1414_v26  ;;  %v933_v24 = vmax.f32 %v1411_v13, 0.0 }
  0x33   : > { %v375_v33 = vadd.f32 %v373_v31, %v367_v28  ;;  %v1419_v28 = vpop.eup %1213 }
  0x34   : > { %v386_v32 = vsel %vm248_vm1, %v374_v30, 0.0  ;;  %v1423_v29 = vadd.f32 1.0, %v1419_v28 }
  0x35   : > { %387 = vadd.xlane.f32.xlu0 %v386_v32  ;;  %v389_v34 = vsel %vm248_vm1, %v375_v33, 0.0 }
  0x39   : > { %390 = vadd.xlane.f32.xlu0 %v389_v34 }
  0x3a   : > { %v1425_v30 = vpop.eup %1215 }
  0x3b   : > { %v1429_v31 = vadd.f32 1.0, %v1425_v30 }
  0xe7   : > { %v286_v35 = vpop.f32.mrb[0].mxu0 }
  0xe8   : > { %v1139_v36 = vpop.f32.mrb[1].mxu0 }
  0xe9   : > { %v289_v37 = vpop.f32.mrb[2].mxu0 }
  0xea   : > { %v293_v38 = vpack.c.bf16 %v289_v37, %v286_v35  ;;  %v1140_v39 = vpop.f32.mrb[3].mxu0  ;;  %v1440_v35 = vunpack.c.h.bf16 %v1306_v2 }
  0xec   : > { %1144 = vmatmul.mubr.msk.bf16.vlgmr.msra.gmra.mrb[0].mxu1 %vm248_vm1, %v293_v38  ;;  %v1449_v38 = vunpack.c.l.bf16 %v1306_v2  ;;  %v555_v2 = vmax.f32 %v1395_v57, 0.0 }
  0xed   : > { %1154 = vmatpush3.bf16.msra.mxu1 %v1334_v6  ;;  %1155 = vmatprep.mubr.msk.bf16.mxu1 %vm1260_vm0, %v1259_v0 }
  0xee   : > { %1165 = vmatprep.subr.bf16.mxu1 %v1259_v0 }
  0xef   : > { %v485_v40 = vpop.f32.mrb[4].mxu0 }
  0xf0   : > { %v1151_v41 = vpop.f32.mrb[5].mxu0 }
  0xf1   : > { %v488_v42 = vpop.f32.mrb[6].mxu0  ;;  %v558_v41 = vmul.f32 %v1391_v55, %v1440_v35 }
  0xf2   : > { %v492_v43 = vpack.c.bf16 %v488_v42, %v485_v40  ;;  %v1152_v44 = vpop.f32.mrb[7].mxu0  ;;  %v556_v40 = vmax.f32 %v1391_v55, 0.0 }
  0xf4   : > { %1156 = vmatmul.mubr.msk.bf16.vlgmr.msra.gmra.mrb[4].mxu1 %vm248_vm1, %v492_v43  ;;  %v1459_v43 = vunpack.c.h.bf16 %v1317_v4  ;;  %v560_v44 = vsub.f32 %v556_v40, %v558_v41 }
  0xf5   : > { %1166 = vmatpush3.bf16.msra.mxu1 %v1334_v6  ;;  %1167 = vmatprep.mubr.msk.bf16.mxu1 %vm1260_vm0, %v1259_v0 }
  0xf6   : > { %1177 = vmatprep.subr.bf16.mxu1 %v1259_v0  ;;  %v747_v58 = vmul.f32 %v1399_v60, %v1459_v43 }
  0xf7   : > { %v674_v45 = vpop.f32.mrb[8].mxu0 }
  0xf8   : > { %v1163_v46 = vpop.f32.mrb[9].mxu0 }
  0xf9   : > { %v677_v47 = vpop.f32.mrb[10].mxu0  ;;  %v557_v46 = vmul.f32 %v1395_v57, %v1449_v38  ;;  %v765_v57 = vsel %vm763_vm5, 1.0, %v1425_v30 }
  0xfa   : > { %v681_v48 = vpack.c.bf16 %v677_v47, %v674_v45  ;;  %v1164_v49 = vpop.f32.mrb[11].mxu0 }
  0xfb   : > { %v1469_v49 = vunpack.c.h.bf16 %v1324_v5  ;;  %v934_v5 = vmax.f32 %v1407_v9, 0.0 }
  0xfc   : > { %1168 = vmatmul.mubr.msk.bf16.vlgmr.msra.gmra.mrb[8].mxu1 %vm248_vm1, %v681_v48  ;;  %v1466_v48 = vunpack.c.l.bf16 %v1317_v4 }
  0xfd   : > { %1178 = vmatpush3.bf16.msra.mxu1 %v1334_v6  ;;  %1179 = vmatprep.mubr.msk.bf16.mxu1 %vm1260_vm0, %v1259_v0  ;;  %v1403_v0 = vld [vmem:[%s1341_s29 + $0x20] sm:$0xff]  ;;  %vm1008_vm0 = vcmask 1042432  }
  0xfe   : > { %v736_v6 = vand.u32 2147483647, %v1403_v0  ;;  %v744_v62 = vmax.f32 %v1403_v0, 0.0  ;;  %v746_v3 = vmul.f32 %v1403_v0, %v1466_v48  ;;  %vm762_vm4 = vcmp.ge.f32.partialorder %v1403_v0, 0.0 }
  0xff   : > { %v863_v50 = vpop.f32.mrb[12].mxu0 }
 0x100   : > { %v1175_v51 = vpop.f32.mrb[13].mxu0  ;;  %v738_v11 = vsub.f32 0.0, %v736_v6  ;;  %v748_v21 = vsub.f32 %v744_v62, %v746_v3  ;;  %v383_v62 = vsel %vm381_vm9, 1.0, %v1353_v16 }
 0x101   : > { %v866_v52 = vpop.f32.mrb[14].mxu0  ;;  %v559_v51 = vsub.f32 %v555_v2, %v557_v46 }
 0x102   : > { %v870_v53 = vpack.c.bf16 %v866_v52, %v863_v50  ;;  %v1176_v54 = vpop.f32.mrb[15].mxu0  ;;  %v740_v14 = vmul.f32 1.442695, %v738_v11  ;;  %v936_v11 = vmul.f32 %v1407_v9, %v1469_v49 }
 0x104   : > { %1180 = vmatmul.mubr.msk.bf16.vlgmr.msra.gmra.mrb[12].mxu1 %vm248_vm1, %v870_v53  ;;  %1217 = vpow2.f32 %v740_v14  ;;  %v745_v53 = vmax.f32 %v1399_v60, 0.0  ;;  %v938_v22 = vsub.f32 %v934_v5, %v936_v11 }
 0x105   : > { %1219 = vpow2.f32 %v931_v23 }
 0x106   : > { %1221 = vpow2.f32 %v929_v25  ;;  %v749_v1 = vsub.f32 %v745_v53, %v747_v58  ;;  %v935_v25 = vmul.f32 %v1411_v13, %v1473_v56 }
 0x107   : > { %1223 = vlog2.f32 %v1417_v27 }
 0x108   : > { %1225 = vlog2.f32 %v1423_v29 }
 0x109   : > { %1227 = vlog2.f32 %v1429_v31 }
 0x10e   : > { %v1431_v32 = vpop.eup %1217 }
 0x10f   : > { %v1435_v33 = vadd.f32 1.0, %v1431_v32  ;;  %v1437_v34 = vpop.eup %1219  ;;  %v764_v55 = vsel %vm762_vm4, 1.0, %v1431_v32 }
 0x110   : > { %v1444_v36 = vadd.f32 1.0, %v1437_v34  ;;  %v1446_v37 = vpop.eup %1221  ;;  %v954_v60 = vsel %vm952_vm7, 1.0, %v1437_v34 }
 0x111   : > { %1229 = vlog2.f32 %v1435_v33  ;;  %v1453_v39 = vadd.f32 1.0, %v1446_v37  ;;  %v1224_v42 = vpop.eup %1223  ;;  %v953_v0 = vsel %vm951_vm6, 1.0, %v1446_v37  ;;  %v382_v37 = vsel %vm380_vm8, 1.0, %v1351_v15 }
 0x112   : > { %1231 = vlog2.f32 %v1444_v36  ;;  %v566_v45 = vmul.f32 0.6931472, %v1224_v42  ;;  %v1226_v47 = vpop.eup %1225 }
 0x113   : > { %1233 = vlog2.f32 %v1453_v39  ;;  %v564_v52 = vmul.f32 0.6931472, %v1226_v47  ;;  %v1228_v54 = vpop.eup %1227 }
 0x114   : > { %v568_v50 = vadd.f32 %v566_v45, %v560_v44  ;;  %v755_v4 = vmul.f32 0.6931472, %v1228_v54  ;;  %v937_v45 = vsub.f32 %v933_v24, %v935_v25  ;;  %1235 = vrcp.f32 %v1417_v27 }
 0x115   : > { %v567_v61 = vadd.f32 %v564_v52, %v559_v51  ;;  %1237 = vrcp.f32 %v1423_v29  ;;  %v575_v54 = vsel %vm573_vm2, 1.0, %v1419_v28  ;;  %v576_v27 = vsel %vm574_vm3, 1.0, %v1414_v26 }
 0x116   : > { %v582_v59 = vsel %vm248_vm1, %v568_v50, 0.0  ;;  %v757_v14 = vadd.f32 %v755_v4, %v749_v1  ;;  %1239 = vrcp.f32 %v1429_v31 }
 0x117   : > { %583 = vadd.xlane.f32.xlu1 %v582_v59  ;;  %v579_v6 = vsel %vm248_vm1, %v567_v61, 0.0  ;;  %1241 = vrcp.f32 %v1435_v33 }
 0x118   : > { %580 = vadd.xlane.f32.xlu0 %v579_v6  ;;  %v771_v41 = vsel %vm248_vm1, %v757_v14, 0.0  ;;  %1243 = vrcp.f32 %v1444_v36 }
 0x119   : > { %1245 = vrcp.f32 %v1453_v39 }
 0x11a   : > { %1247 = vrcp.f32 %v1356_v17 }
 0x11b   : > { %v1230_v63 = vpop.eup %1229  ;;  %772 = vadd.xlane.f32.xlu1 %v771_v41  ;;  %1249 = vrcp.f32 %v1359_v18 }
 0x11c   : > { %v753_v10 = vmul.f32 0.6931472, %v1230_v63  ;;  %v1232_v12 = vpop.eup %1231 }
 0x11d   : > { %v944_v23 = vmul.f32 0.6931472, %v1232_v12  ;;  %v1234_v40 = vpop.eup %1233 }
 0x11e   : > { %v756_v42 = vadd.f32 %v753_v10, %v748_v21  ;;  %v942_v2 = vmul.f32 0.6931472, %v1234_v40  ;;  %v1236_v52 = vpop.eup %1235 }
 0x11f   : > { %v946_v44 = vadd.f32 %v944_v23, %v938_v22  ;;  %v1238_v53 = vpop.eup %1237  ;;  %v1502_v29 = vmul.f32 %v1236_v52, %v576_v27 }
 0x120   : > { %v768_v46 = vsel %vm248_vm1, %v756_v42, 0.0  ;;  %v945_v50 = vadd.f32 %v942_v2, %v937_v45  ;;  %v1500_v58 = vmul.f32 %v1238_v53, %v575_v54  ;;  %v1240_v59 = vpop.eup %1239 }
 0x121   : > { %769 = vadd.xlane.f32.xlu0 %v768_v46  ;;  %v960_v47 = vsel %vm248_vm1, %v946_v44, 0.0  ;;  %v1242_v61 = vpop.eup %1241  ;;  %v1512_v26 = vmul.f32 %v1240_v59, %v765_v57 }
 0x122   : > { %961 = vadd.xlane.f32.xlu1 %v960_v47  ;;  %v957_v51 = vsel %vm248_vm1, %v945_v50, 0.0  ;;  %v1510_v28 = vmul.f32 %v1242_v61, %v764_v55  ;;  %v1244_v31 = vpop.eup %1243  ;;  %v591_v27 = vmul.f32 %v1500_v58, %v1449_v38  ;;  %v601_v59 = vadd.f32 %v1500_v58, %v1449_v38 }
 0x123   : > { %v1246_v33 = vpop.eup %1245  ;;  %v1520_v39 = vmul.f32 %v1244_v31, %v954_v60 }
 0x124   : > { %v1518_v36 = vmul.f32 %v1246_v33, %v953_v0  ;;  %v1248_v13 = vpop.eup %1247  ;;  %v592_v33 = vmul.f32 %v1502_v29, %v1440_v35 }
 0x125   : > { %958 = vadd.xlane.f32.xlu0 %v957_v51  ;;  %v1250_v4 = vpop.eup %1249  ;;  %v384_v3 = vmul.f32 %v1248_v13, %v382_v37 }
 0x126   : > { %v385_v6 = vmul.f32 %v1250_v4, %v383_v62 }
 0x127   : > { %v398_v11 = vmul.f32 %v384_v3, %v1362_v19  ;;  %v408_v15 = vadd.f32 %v384_v3, %v1362_v19 }
 0x128   : > { %v399_v22 = vmul.f32 %v385_v6, %v1365_v20  ;;  %v409_v24 = vadd.f32 %v385_v6, %v1365_v20  ;;  %v780_v6 = vmul.f32 %v1510_v28, %v1466_v48 }
 0x1bf   : > { %v337_v30 = vpop.f32.mrb[0].mxu1 }
 0x1c0   : > { %v344_v32 = vmul.f32 0.0010405828, %v337_v30  ;;  %v1145_v9 = vpop.f32.mrb[1].mxu1  ;;  %v602_v30 = vadd.f32 %v1502_v29, %v1440_v35 }
 0x1c1   : > { %v340_v34 = vpop.f32.mrb[2].mxu1 }
 0x1c2   : > { %v346_v63 = vsub.f32 %v344_v32, %v1362_v19  ;;  %v345_v1 = vmul.f32 0.0010405828, %v340_v34  ;;  %v1146_v17 = vpop.f32.mrb[3].mxu1 }
 0x1c4   : > { %v348_v18 = vand.u32 2147483647, %v346_v63  ;;  %v347_v7 = vsub.f32 %v345_v1, %v1365_v20 }
 0x1c6   : > { %v350_v8 = vmul.f32 5.0, %v348_v18  ;;  %v349_v10 = vand.u32 2147483647, %v347_v7 }
 0x1c7   : > { %v530_v5 = vpop.f32.mrb[4].mxu1 }
 0x1c8   : > { %v352_v12 = vadd.f32 1.0, %v350_v8  ;;  %v351_v14 = vmul.f32 5.0, %v349_v10  ;;  %v537_v21 = vmul.f32 0.0010405828, %v530_v5  ;;  %v1157_v16 = vpop.f32.mrb[5].mxu1  ;;  %v790_v8 = vadd.f32 %v1510_v28, %v1466_v48 }
 0x1c9   : > { %v533_v23 = vpop.f32.mrb[6].mxu1 }
 0x1ca   : > { %v353_v25 = vadd.f32 1.0, %v351_v14  ;;  %v539_v40 = vsub.f32 %v537_v21, %v1449_v38  ;;  %v538_v41 = vmul.f32 0.0010405828, %v533_v23  ;;  %v1158_v42 = vpop.f32.mrb[7].mxu1  ;;  %v392_v44 = vsel %vm248_vm1, %v352_v12, 0.0 }
 0x1cb   : > { %393 = vadd.xlane.f32.xlu1 %v392_v44  ;;  %v400_v45 = vmul.f32 %v398_v11, %v352_v12  ;;  %v410_v2 = vmul.f32 %v408_v15, %v352_v12  ;;  %v781_v15 = vmul.f32 %v1512_v26, %v1459_v43  ;;  %v791_v21 = vadd.f32 %v1512_v26, %v1459_v43 }
 0x1cc   : > { %v541_v19 = vand.u32 2147483647, %v539_v40  ;;  %v540_v46 = vsub.f32 %v538_v41, %v1440_v35  ;;  %v401_v47 = vmul.f32 %v399_v22, %v353_v25  ;;  %v411_v51 = vmul.f32 %v409_v24, %v353_v25 }
 0x1cd   : > { %v402_v50 = vsel %vm248_vm1, %v400_v45, 0.0  ;;  %v395_v20 = vsel %vm248_vm1, %v353_v25, 0.0  ;;  %v412_v0 = vsel %vm248_vm1, %v410_v2, 0.0 }
 0x1ce   : > { %v543_v52 = vmul.f32 5.0, %v541_v19  ;;  %v542_v53 = vand.u32 2147483647, %v540_v46  ;;  %403 = vadd.xlane.f32.xlu0 %v402_v50  ;;  %v405_v32 = vsel %vm248_vm1, %v401_v47, 0.0  ;;  %v415_v29 = vsel %vm248_vm1, %v411_v51, 0.0 }
 0x1cf   : > { %396 = vadd.xlane.f32.xlu1 %v395_v20  ;;  %v719_v54 = vpop.f32.mrb[8].mxu1  ;;  %v979_v46 = vadd.f32 %v1518_v36, %v1473_v56 }
 0x1d0   : > { %v545_v61 = vadd.f32 1.0, %v543_v52  ;;  %v544_v55 = vmul.f32 5.0, %v542_v53  ;;  %v726_v57 = vmul.f32 0.0010405828, %v719_v54  ;;  %v1169_v31 = vpop.f32.mrb[9].mxu1  ;;  %v970_v52 = vmul.f32 %v1520_v39, %v1469_v49 }
 0x1d1   : > { %v722_v60 = vpop.f32.mrb[10].mxu1  ;;  %v980_v53 = vadd.f32 %v1520_v39, %v1469_v49 }
 0x1d2   : > { %v546_v13 = vadd.f32 1.0, %v544_v55  ;;  %413 = vadd.xlane.f32.xlu0 %v412_v0  ;;  %v728_v9 = vsub.f32 %v726_v57, %v1466_v48  ;;  %v727_v38 = vmul.f32 0.0010405828, %v722_v60  ;;  %v1170_v58 = vpop.f32.mrb[11].mxu1  ;;  %v585_v37 = vsel %vm248_vm1, %v545_v61, 0.0 }
 0x1d3   : > { %406 = vadd.xlane.f32.xlu1 %v405_v32  ;;  %v593_v4 = vmul.f32 %v591_v27, %v545_v61  ;;  %v603_v34 = vmul.f32 %v601_v59, %v545_v61  ;;  %v388_v32 = vpop.xlane.xlu0 %387 }
 0x1d4   : > { %v730_v62 = vand.u32 2147483647, %v728_v9  ;;  %v729_v63 = vsub.f32 %v727_v38, %v1459_v43  ;;  %v594_v1 = vmul.f32 %v592_v33, %v546_v13  ;;  %v604_v17 = vmul.f32 %v602_v30, %v546_v13  ;;  %v584_v38 = vpop.xlane.xlu1 %583 }
 0x1d5   : > { %v595_v18 = vsel %vm248_vm1, %v593_v4, 0.0  ;;  %v588_v22 = vsel %vm248_vm1, %v546_v13, 0.0  ;;  %v605_v44 = vsel %vm248_vm1, %v603_v34, 0.0  ;;  %v969_v43 = vmul.f32 %v1518_v36, %v1473_v56 }
 0x1d6   : > { %v732_v3 = vmul.f32 5.0, %v730_v62  ;;  %586 = vadd.xlane.f32.xlu0 %v585_v37  ;;  %v731_v35 = vand.u32 2147483647, %v729_v63  ;;  %v598_v26 = vsel %vm248_vm1, %v594_v1, 0.0  ;;  %v608_v54 = vsel %vm248_vm1, %v604_v17, 0.0 }
 0x1d7   : > { %416 = vadd.xlane.f32.xlu1 %v415_v29  ;;  %v908_v7 = vpop.f32.mrb[12].mxu1  ;;  %v391_v9 = vpop.xlane.xlu0 %390 }
 0x1d8   : > { %v733_v10 = vmul.f32 5.0, %v731_v35  ;;  %v915_v5 = vmul.f32 0.0010405828, %v908_v7  ;;  %v1181_v11 = vpop.f32.mrb[13].mxu1  ;;  %v734_v12 = vadd.f32 1.0, %v732_v3  ;;  %v773_v37 = vpop.xlane.xlu1 %772 }
 0x1d9   : > { %v911_v14 = vpop.f32.mrb[14].mxu1 }
 0x1da   : > { %v735_v16 = vadd.f32 1.0, %v733_v10  ;;  %596 = vadd.xlane.f32.xlu0 %v595_v18  ;;  %v917_v23 = vsub.f32 %v915_v5, %v1473_v56  ;;  %v916_v24 = vmul.f32 0.0010405828, %v911_v14  ;;  %v1182_v25 = vpop.f32.mrb[15].mxu1  ;;  %v782_v48 = vmul.f32 %v780_v6, %v734_v12 }
 0x1db   : > { %589 = vadd.xlane.f32.xlu1 %v588_v22  ;;  %v792_v28 = vmul.f32 %v790_v8, %v734_v12  ;;  %v774_v47 = vsel %vm248_vm1, %v734_v12, 0.0  ;;  %v581_v58 = vpop.xlane.xlu0 %580 }
 0x1dc   : > { %v919_v40 = vand.u32 2147483647, %v917_v23  ;;  %v918_v41 = vsub.f32 %v916_v24, %v1469_v49  ;;  %v783_v42 = vmul.f32 %v781_v15, %v735_v16  ;;  %v793_v45 = vmul.f32 %v791_v21, %v735_v16  ;;  %v1588_v34 = vpop.xlane.xlu1 %961 }
 0x1dd   : > { %v784_v56 = vsel %vm248_vm1, %v782_v48, 0.0  ;;  %v777_v55 = vsel %vm248_vm1, %v735_v16, 0.0  ;;  %v794_v57 = vsel %vm248_vm1, %v792_v28, 0.0 }
 0x1de   : > { %606 = vadd.xlane.f32.xlu0 %v605_v44  ;;  %v921_v2 = vmul.f32 5.0, %v919_v40  ;;  %v920_v19 = vand.u32 2147483647, %v918_v41  ;;  %v787_v49 = vsel %vm248_vm1, %v783_v42, 0.0  ;;  %v797_v31 = vsel %vm248_vm1, %v793_v45, 0.0 }
 0x1df   : > { %599 = vadd.xlane.f32.xlu1 %v598_v26  ;;  %v770_v4 = vpop.xlane.xlu0 %769 }
 0x1e0   : > { %v923_v50 = vadd.f32 1.0, %v921_v2  ;;  %v922_v51 = vmul.f32 5.0, %v920_v19 }
 0x1e2   : > { %775 = vadd.xlane.f32.xlu0 %v774_v47  ;;  %v924_v20 = vadd.f32 1.0, %v922_v51  ;;  %v971_v27 = vmul.f32 %v969_v43, %v923_v50  ;;  %v981_v59 = vmul.f32 %v979_v46, %v923_v50  ;;  %v963_v39 = vsel %vm248_vm1, %v923_v50, 0.0 }
 0x1e3   : > { %609 = vadd.xlane.f32.xlu1 %v608_v54  ;;  %v959_v62 = vpop.xlane.xlu0 %958 }
 0x1e4   : > { %v972_v36 = vmul.f32 %v970_v52, %v924_v20  ;;  %v982_v61 = vmul.f32 %v980_v53, %v924_v20  ;;  %v973_v33 = vsel %vm248_vm1, %v971_v27, 0.0  ;;  %v966_v0 = vsel %vm248_vm1, %v924_v20, 0.0 }
 0x1e5   : > { %v983_v60 = vsel %vm248_vm1, %v981_v59, 0.0 }
 0x1e6   : > { %785 = vadd.xlane.f32.xlu0 %v784_v56  ;;  %v976_v30 = vsel %vm248_vm1, %v972_v36, 0.0  ;;  %v986_v13 = vsel %vm248_vm1, %v982_v61, 0.0 }
 0x1e7   : > { %778 = vadd.xlane.f32.xlu1 %v777_v55 }
 0x1ea   : > { %795 = vadd.xlane.f32.xlu0 %v794_v57 }
 0x1eb   : > { %788 = vadd.xlane.f32.xlu1 %v787_v49 }
 0x1ee   : > { %964 = vadd.xlane.f32.xlu0 %v963_v39 }
 0x1ef   : > { %798 = vadd.xlane.f32.xlu1 %v797_v31 }
 0x1f2   : > { %974 = vadd.xlane.f32.xlu0 %v973_v33 }
 0x1f3   : > { %967 = vadd.xlane.f32.xlu1 %v966_v0 }
 0x1f6   : > { %984 = vadd.xlane.f32.xlu0 %v983_v60 }
 0x1f7   : > { %977 = vadd.xlane.f32.xlu1 %v976_v30 }
 0x1fb   : > { %987 = vadd.xlane.f32.xlu1 %v986_v13 }
 0x258   : > { %v394_v63 = vpop.xlane.xlu1 %393 }
 0x259   : > { %v419_v16 = vsel %vm418_vm10, %v388_v32, %v394_v63 }
 0x25b   : > { %v404_v1 = vpop.xlane.xlu0 %403 }
 0x25c   : > { %v397_v17 = vpop.xlane.xlu1 %396  ;;  %v422_v42 = vsel %vm421_vm11, %v419_v16, %v404_v1 }
 0x25d   : > { %v420_v22 = vsel %vm418_vm10, %v391_v9, %v397_v17 }
 0x25f   : > { %v414_v3 = vpop.xlane.xlu0 %413 }
 0x260   : > { %v407_v35 = vpop.xlane.xlu1 %406  ;;  %v425_v43 = vsel %vm424_vm12, %v422_v42, %v414_v3 }
 0x261   : > { %v423_v25 = vsel %vm421_vm11, %v420_v22, %v407_v35  ;;  %v428_v53 = vsel %vm427_vm13, %v425_v43, 0.0 }
 0x263   : > { %v587_v29 = vpop.xlane.xlu0 %586 }
 0x264   : > { %v417_v18 = vpop.xlane.xlu1 %416  ;;  %v611_v23 = vsel %vm418_vm10, %v581_v58, %v587_v29 }
 0x265   : > { %v426_v28 = vsel %vm424_vm12, %v423_v25, %v417_v18 }
 0x266   : > { %v429_v2 = vsel %vm427_vm13, %v426_v28, 0.0 }
 0x267   : > { %v597_v7 = vpop.xlane.xlu0 %596  ;;  %v430_v27 = vadd.f32 %v429_v2, %v428_v53 }
 0x268   : > { %v590_v6 = vpop.xlane.xlu1 %589  ;;  %v613_v48 = vsel %vm421_vm11, %v611_v23, %v597_v7 }
 0x269   : > { %v612_v15 = vsel %vm418_vm10, %v584_v38, %v590_v6  ;;  %v431_v39 = vrot.slane %v430_v27, 4 }
 0x26b   : > { %v607_v8 = vpop.xlane.xlu0 %606  ;;  %v432_v13 = vadd.f32 %v431_v39, %v430_v27 }
 0x26c   : > { %v600_v10 = vpop.xlane.xlu1 %599  ;;  %v615_v40 = vsel %vm424_vm12, %v613_v48, %v607_v8 }
 0x26d   : > { %v614_v14 = vsel %vm421_vm11, %v612_v15, %v600_v10  ;;  %v617_v19 = vsel %vm427_vm13, %v615_v40, 0.0  ;;  %v433_v17 = vrot.slane %v432_v13, 2 }
 0x26f   : > { %v776_v5 = vpop.xlane.xlu0 %775  ;;  %v434_v6 = vadd.f32 %v433_v17, %v432_v13 }
 0x270   : > { %v610_v11 = vpop.xlane.xlu1 %609  ;;  %v800_v26 = vsel %vm418_vm10, %v770_v4, %v776_v5 }
 0x271   : > { %v616_v24 = vsel %vm424_vm12, %v614_v14, %v610_v11  ;;  %v435_v11 = vrot.slane %v434_v6, 1 }
 0x272   : > { %v618_v44 = vsel %vm427_vm13, %v616_v24, 0.0 }
 0x273   : > { %v786_v12 = vpop.xlane.xlu0 %785  ;;  %v619_v47 = vadd.f32 %v618_v44, %v617_v19  ;;  %v436_v16 = vadd.f32 %v435_v11, %v434_v6 }
 0x274   : > { %v779_v21 = vpop.xlane.xlu1 %778  ;;  %v802_v46 = vsel %vm421_vm11, %v800_v26, %v786_v12 }
 0x275   : > { %v801_v50 = vsel %vm418_vm10, %v773_v37, %v779_v21  ;;  %v620_v61 = vrot.slane %v619_v47, 4 }
 0x277   : > { %v796_v41 = vpop.xlane.xlu0 %795  ;;  %v621_v33 = vadd.f32 %v620_v61, %v619_v47 }
 0x278   : > { %v789_v45 = vpop.xlane.xlu1 %788  ;;  %v804_v51 = vsel %vm424_vm12, %v802_v46, %v796_v41 }
 0x279   : > { %v803_v20 = vsel %vm421_vm11, %v801_v50, %v789_v45  ;;  %v806_v56 = vsel %vm427_vm13, %v804_v51, 0.0  ;;  %v622_v38 = vrot.slane %v621_v33, 2 }
 0x27b   : > { %v965_v52 = vpop.xlane.xlu0 %964  ;;  %v623_v29 = vadd.f32 %v622_v38, %v621_v33 }
 0x27c   : > { %v799_v54 = vpop.xlane.xlu1 %798  ;;  %v989_v32 = vsel %vm418_vm10, %v959_v62, %v965_v52 }
 0x27d   : > { %v805_v59 = vsel %vm424_vm12, %v803_v20, %v799_v54  ;;  %v624_v8 = vrot.slane %v623_v29, 1 }
 0x27e   : > { %v807_v36 = vsel %vm427_vm13, %v805_v59, 0.0 }
 0x27f   : > { %v808_v55 = vadd.f32 %v807_v36, %v806_v56  ;;  %v975_v57 = vpop.xlane.xlu0 %974  ;;  %v625_v12 = vadd.f32 %v624_v8, %v623_v29 }
 0x280   : > { %v968_v49 = vpop.xlane.xlu1 %967  ;;  %v991_v9 = vsel %vm421_vm11, %v989_v32, %v975_v57 }
 0x281   : > { %v809_v31 = vrot.slane %v808_v55, 4  ;;  %v990_v58 = vsel %vm418_vm10, %v1588_v34, %v968_v49  ;;  %v1005_v23 = vsel %vm1004_vm14, %v436_v16, %v625_v12 }
 0x283   : > { %v810_v0 = vadd.f32 %v809_v31, %v808_v55  ;;  %v985_v60 = vpop.xlane.xlu0 %984 }
 0x284   : > { %v978_v30 = vpop.xlane.xlu1 %977  ;;  %v993_v37 = vsel %vm424_vm12, %v991_v9, %v985_v60 }
 0x285   : > { %v811_v4 = vrot.slane %v810_v0, 2  ;;  %v992_v63 = vsel %vm421_vm11, %v990_v58, %v978_v30  ;;  %v995_v35 = vsel %vm427_vm13, %v993_v37, 0.0 }
 0x287   : > { %v812_v7 = vadd.f32 %v811_v4, %v810_v0 }
 0x288   : > { %v988_v1 = vpop.xlane.xlu1 %987 }
 0x289   : > { %v994_v3 = vsel %vm424_vm12, %v992_v63, %v988_v1  ;;  %v813_v5 = vrot.slane %v812_v7, 1 }
 0x28a   : > { %v996_v62 = vsel %vm427_vm13, %v994_v3, 0.0 }
 0x28b   : > { %v997_v18 = vadd.f32 %v996_v62, %v995_v35  ;;  %v814_v21 = vadd.f32 %v813_v5, %v812_v7 }
 0x28d   : > { %v998_v34 = vrot.slane %v997_v18, 4  ;;  %v1007_v25 = vsel %vm1006_vm15, %v1005_v23, %v814_v21 }
 0x28f   : > { %v999_v10 = vadd.f32 %v998_v34, %v997_v18 }
 0x291   : > { %v1000_v15 = vrot.slane %v999_v10, 2 }
 0x293   : > { %v1001_v14 = vadd.f32 %v1000_v15, %v999_v10 }
 0x295   : > { %v1002_v22 = vrot.slane %v1001_v14, 1 }
 0x297   : > { %v1003_v24 = vadd.f32 %v1002_v22, %v1001_v14 }
 0x299   : > { %v1009_v48 = vsel %vm1008_vm0, %v1007_v25, %v1003_v24 }
 0x29a   : > { %v1010_v28 = vsel %vm427_vm13, %v1009_v48, 0.0 }
 0x29b   : > { %1011 = vst [vmem:[%s225_s7] sm:$0xf] %v1010_v28 }
 0x29c PF: > { %s14_s15 = sadd.s32 1, %s1257_s15  }
 0x29d   : > { %p11_p5 = scmp.ge.s32.totalorder %s14_s15, 4  }
 0x29f   :  { %13 = sbr.rel (!%p11_p5) target bundleno = 1 (0x1), region = 75 }

</bundles_post_ra>
